<compile_context>
chip_gen: v5e
topology: v5e:2x2
jax: 0.10.0
libtpu: 0.0.40
codegen_flags: <defaults>
</compile_context>

<pallas_src>
import functools

import jax
import jax.numpy as jnp
from jax import lax
from jax.experimental import pallas as pl
from jax.experimental.pallas import tpu as pltpu

_EPS = 1e-6
_DEFAULT_INPUT_BUDGET = 8 << 20   # target for the double-buffered input tiles


def _rup(a, m):
    return (a + m - 1) // m * m


def _sublanes(dtype):
    """Native sublane multiple of the (sublane, 128) VMEM tiling for dtype."""
    return max(8, 32 // jnp.dtype(dtype).itemsize)


def _dice_partial_kernel(x_ref, t_ref, out_ref, inter_acc, ssum_acc, *,
                         needs_mask, dim, tile, tps):
    """Grid = (split, N, k): accumulate per-channel [sum(x*t), sum(x+t)]."""
    k = pl.program_id(2)

    @pl.when(k == 0)
    def _init():
        inter_acc[...] = jnp.zeros_like(inter_acc)
        ssum_acc[...] = jnp.zeros_like(ssum_acc)

    x = x_ref[...]            # (C, tile_r, lane_w) dense path or (C, tile_l)
    t = t_ref[...]

    if needs_mask:
        # Tail rows/lanes of the last (or overshooting, clamped) tile hold
        # unspecified data -> zero them BEFORE they can reach the reductions.
        gk = pl.program_id(0) * tps + k            # global tile index
        limit = dim - gk * tile                    # valid rows/lanes this tile
        if x.ndim == 3:                            # mask along the tile_r axis
            idx = lax.broadcasted_iota(jnp.int32, (x.shape[1], 1), 0)
        else:                                      # mask along the lane axis
            idx = lax.broadcasted_iota(jnp.int32, (1, x.shape[1]), 1)
        valid = idx < limit
        x = jnp.where(valid, x, 0)
        t = jnp.where(valid, t, 0)

    xf = x.astype(jnp.float32)
    tf = t.astype(jnp.float32)
    pr = xf * tf
    sm = xf + tf
    while pr.ndim > 2:                 # reduce everything but the channel axis
        pr = pr.sum(axis=-1)
        sm = sm.sum(axis=-1)
    inter_acc[...] += pr.sum(axis=-1, keepdims=True)     # (C, 1)
    ssum_acc[...] += sm.sum(axis=-1, keepdims=True)      # (C, 1)

    @pl.when(k == pl.num_programs(2) - 1)
    def _flush():
        out_ref[:, 0:1] = inter_acc[...]
        out_ref[:, 1:2] = ssum_acc[...]


@functools.partial(jax.jit, static_argnames=("input_budget_bytes",))
def dice_loss(inp, target, *, input_budget_bytes=_DEFAULT_INPUT_BUDGET):
    """1 - multiclass_dice_coeff(inp, target); inp/target are NCHW, same shape."""
    assert inp.shape == target.shape
    N, C, H, W = inp.shape
    L = H * W
    bytes_x = jnp.dtype(inp.dtype).itemsize
    bytes_t = jnp.dtype(target.dtype).itemsize

    x3 = inp.reshape(N, C, L)          # free reshape of contiguous NCHW
    t3 = target.reshape(N, C, L)

    # ---- layout: sublane-dense (N, C, R, lane_w) when L divides by 128 ------
    lane_w = next((w for w in (512, 256, 128) if L % w == 0), None)

    if lane_w is not None:
        R = L // lane_w
        x_in = x3.reshape(N, C, R, lane_w)
        t_in = t3.reshape(N, C, R, lane_w)
        subl = max(_sublanes(inp.dtype), _sublanes(target.dtype))
        # double-buffered bytes per unit of tile_r, both inputs:
        unit = 2 * C * lane_w * (bytes_x + bytes_t)
        max_tile_r = max(1, input_budget_bytes // unit)
        if R <= max_tile_r or R <= subl:
            tile = R                                   # full dim (always legal)
        else:
            tile = max(subl, (max_tile_r // subl) * subl)
        dim = R
        num_tiles = pl.cdiv(R, tile)
        blk = (pl.Squeezed(), C, tile, lane_w)
        buf = 2 * C * lane_w * (_rup(tile, _sublanes(inp.dtype)) * bytes_x +
                                _rup(tile, _sublanes(target.dtype)) * bytes_t)
        f32_tile = C * _rup(tile, 8) * lane_w * 4
    else:
        # 3-D fallback: block (C, tile_l); the C sublane dim gets padded to the
        # native sublane multiple in VMEM, which the budget accounts for.
        x_in, t_in = x3, t3
        cpx = _rup(C, _sublanes(inp.dtype))
        cpt = _rup(C, _sublanes(target.dtype))
        unit = 2 * 128 * (cpx * bytes_x + cpt * bytes_t)   # per 128-lane chunk
        max_chunks = max(1, input_budget_bytes // unit)
        tile = L if L <= max_chunks * 128 else max_chunks * 128
        dim = L
        num_tiles = pl.cdiv(L, tile)
        blk = (pl.Squeezed(), C, tile)
        buf = 2 * _rup(tile, 128) * (cpx * bytes_x + cpt * bytes_t)
        f32_tile = _rup(C, 8) * _rup(tile, 128) * 4

    # Split the spatial reduction across a 2nd parallel axis when N alone gives
    # poor megacore balance (N == 1 or odd); neutral on single-TC chips.
    n_splits = 2 if (num_tiles >= 2 and N % 2 == 1) else 1
    tps = pl.cdiv(num_tiles, n_splits)
    needs_mask = (n_splits * tps * tile != dim)

    if lane_w is not None:
        def in_map(s, n, k):
            return (n, 0, jnp.minimum(s * tps + k, num_tiles - 1), 0)
    else:
        def in_map(s, n, k):
            return (n, 0, jnp.minimum(s * tps + k, num_tiles - 1))

    # Explicit scoped-VMEM limit: double-buffered (sublane-padded) inputs +
    # f32 elementwise temporaries + slack.
    # TODO(synk): block over C (extra grid axis) if this ever approaches the
    # chip's physical VMEM for very wide channel counts.
    vmem_limit = int(max(32 << 20, buf + 6 * f32_tile + (4 << 20)))

    cost = pl.CostEstimate(
        flops=3 * N * C * L,
        transcendentals=0,
        bytes_accessed=N * C * L * (bytes_x + bytes_t) + n_splits * N * C * 2 * 4,
    )

    kernel = functools.partial(
        _dice_partial_kernel,
        needs_mask=needs_mask, dim=dim, tile=tile, tps=tps)

    parts = pl.pallas_call(
        kernel,
        out_shape=jax.ShapeDtypeStruct((n_splits, N, C, 2), jnp.float32),
        grid_spec=pltpu.PrefetchScalarGridSpec(
            num_scalar_prefetch=0,
            grid=(n_splits, N, tps),
            in_specs=[
                pl.BlockSpec(blk, in_map),
                pl.BlockSpec(blk, in_map),
            ],
            out_specs=pl.BlockSpec(
                (pl.Squeezed(), pl.Squeezed(), C, 2), lambda s, n, k: (s, n, 0, 0)),
            scratch_shapes=[
                pltpu.VMEM((C, 1), jnp.float32),   # sum(x*t) accumulator
                pltpu.VMEM((C, 1), jnp.float32),   # sum(x)+sum(t) accumulator
            ],
        ),
        compiler_params=pltpu.CompilerParams(
            dimension_semantics=("parallel", "parallel", "arbitrary"),
            vmem_limit_bytes=vmem_limit,
        ),
        cost_estimate=cost,
    )(x_in, t_in)

    # Tiny finalize on the (splits, N, C, 2) partials.
    totals = jnp.sum(parts, axis=(0, 1))            # (C, 2)
    inter_c = totals[:, 0]
    ssum_c = totals[:, 1]
    dice_c = jnp.where(ssum_c == 0.0, 1.0, (2.0 * inter_c + _EPS) / (ssum_c + _EPS))
    return 1.0 - jnp.mean(dice_c)


def _dice_loss_ref(inp, target, eps=_EPS):
    """Pure-JAX reference mirroring the PyTorch code."""
    x = inp.astype(jnp.float32)
    t = target.astype(jnp.float32)
    C = x.shape[1]
    dice = 0.0
    for c in range(C):
        xc = x[:, c].reshape(-1)
        tc = t[:, c].reshape(-1)
        inter = jnp.dot(xc, tc)
        sets_sum = jnp.sum(xc) + jnp.sum(tc)
        dice_c = jnp.where(sets_sum == 0.0, 1.0, (2 * inter + eps) / (sets_sum + eps))
        dice = dice + dice_c
    return 1.0 - dice / C


if __name__ == "__main__":
    key = jax.random.PRNGKey(0)

    def make_case(k, N, C, H, W):
        k1, k2 = jax.random.split(k)
        logits = jax.random.normal(k1, (N, C, H, W), dtype=jnp.float32)
        probs = jax.nn.softmax(logits, axis=1)                     # "input"
        labels = jax.random.randint(k2, (N, H, W), 0, C)
        onehot = jax.nn.one_hot(labels, C, axis=1, dtype=jnp.float32)  # "target"
        return probs, onehot

    # (shape, input_budget_bytes).  The tiny budgets force multi-tile grids so
    # the masking / split / 3-D-fallback paths are exercised at small sizes.
    cases = [
        ((2, 4, 16, 16), _DEFAULT_INPUT_BUDGET),  # dense 4-D path, single tile
        ((2, 4, 16, 88), 64 * 1024),              # dense 4-D path, ragged tile_r tail
        ((1, 3, 5, 67), 16 * 1024),               # 3-D fallback + split + overshoot clamp
    ]

    keys = jax.random.split(key, len(cases))
    for (shape, budget), kk in zip(cases, keys):
        probs, onehot = make_case(kk, *shape)
        out = jax.block_until_ready(dice_loss(probs, onehot, input_budget_bytes=budget))
        ref = _dice_loss_ref(probs, onehot)
        assert jnp.allclose(out, ref, atol=1e-5, rtol=1e-5), (shape, out, ref)

    print("KERNEL_OK")
</pallas_src>

<mosaic_0001>
module attributes {stable_mosaic.version = 11 : i64} {
  func.func @_dice_partial_kernel(%arg0: i32, %arg1: i32, %arg2: i32, %arg3: memref<1x4x1x256xf32, #tpu.memory_space<vmem>>, %arg4: memref<1x4x1x256xf32, #tpu.memory_space<vmem>>, %arg5: memref<1x1x4x2xf32, #tpu.memory_space<vmem>>, %arg6: memref<4x1xf32, #tpu.memory_space<vmem>>, %arg7: memref<4x1xf32, #tpu.memory_space<vmem>>) attributes {dimension_semantics = [#tpu.dimension_semantics<parallel>, #tpu.dimension_semantics<parallel>, #tpu.dimension_semantics<arbitrary>], iteration_bounds = array<i64: 1, 2, 1>, scalar_prefetch = 0 : i64, scratch_operands = 2 : i64, tpu.core_type = #tpu.core_type<tc>, window_params = [{transform_indices = @transform_0, window_bounds = array<i64: 1, 4, 1, 256>}, {transform_indices = @transform_1, window_bounds = array<i64: 1, 4, 1, 256>}, {transform_indices = @transform_2, window_bounds = array<i64: 1, 1, 4, 2>}]} {
    %c0_i32 = arith.constant 0 : i32
    %0 = arith.cmpi eq, %arg2, %c0_i32 : i32
    %1 = arith.extui %0 : i1 to i32
    %c0_i32_0 = arith.constant 0 : i32
    %2 = arith.cmpi ne, %1, %c0_i32_0 : i32
    scf.if %2 {
      %cst_21 = arith.constant 0.000000e+00 : f32
      %24 = vector.broadcast %cst_21 : f32 to vector<4x1xf32>
      %c0_22 = arith.constant 0 : index
      %c0_23 = arith.constant 0 : index
      %25 = vector.load %arg6[%c0_22, %c0_23] : memref<4x1xf32, #tpu.memory_space<vmem>>, vector<4x1xf32>
      tpu.vector_store %arg6[%c0_22, %c0_23], %24 {strides = array<i32>} : memref<4x1xf32, #tpu.memory_space<vmem>>, vector<4x1xf32>,
      %cst_24 = arith.constant 0.000000e+00 : f32
      %26 = vector.broadcast %cst_24 : f32 to vector<4x1xf32>
      %c0_25 = arith.constant 0 : index
      %c0_26 = arith.constant 0 : index
      %27 = vector.load %arg7[%c0_25, %c0_26] : memref<4x1xf32, #tpu.memory_space<vmem>>, vector<4x1xf32>
      tpu.vector_store %arg7[%c0_25, %c0_26], %26 {strides = array<i32>} : memref<4x1xf32, #tpu.memory_space<vmem>>, vector<4x1xf32>,
    } else {
    }
    %c0 = arith.constant 0 : index
    %c0_1 = arith.constant 0 : index
    %c0_2 = arith.constant 0 : index
    %c0_3 = arith.constant 0 : index
    %3 = vector.load %arg3[%c0, %c0_1, %c0_2, %c0_3] : memref<1x4x1x256xf32, #tpu.memory_space<vmem>>, vector<1x4x1x256xf32>
    %4 = vector.shape_cast %3 : vector<1x4x1x256xf32> to vector<4x1x256xf32>
    %c0_4 = arith.constant 0 : index
    %c0_5 = arith.constant 0 : index
    %c0_6 = arith.constant 0 : index
    %c0_7 = arith.constant 0 : index
    %5 = vector.load %arg4[%c0_4, %c0_5, %c0_6, %c0_7] : memref<1x4x1x256xf32, #tpu.memory_space<vmem>>, vector<1x4x1x256xf32>
    %6 = vector.shape_cast %5 : vector<1x4x1x256xf32> to vector<4x1x256xf32>
    %7 = arith.mulf %4, %6 : vector<4x1x256xf32>
    %8 = arith.addf %4, %6 : vector<4x1x256xf32>
    %cst = arith.constant dense<0.000000e+00> : vector<4x1xf32>
    %9 = vector.multi_reduction <add>, %7, %cst [2] : vector<4x1x256xf32> to vector<4x1xf32>
    %cst_8 = arith.constant dense<0.000000e+00> : vector<4x1xf32>
    %10 = vector.multi_reduction <add>, %8, %cst_8 [2] : vector<4x1x256xf32> to vector<4x1xf32>
    %c0_9 = arith.constant 0 : index
    %c0_10 = arith.constant 0 : index
    %11 = vector.load %arg6[%c0_9, %c0_10] : memref<4x1xf32, #tpu.memory_space<vmem>>, vector<4x1xf32>
    %cst_11 = arith.constant dense<0.000000e+00> : vector<4xf32>
    %12 = vector.multi_reduction <add>, %9, %cst_11 [1] : vector<4x1xf32> to vector<4xf32>
    %13 = vector.shape_cast %12 : vector<4xf32> to vector<4x1xf32>
    %14 = arith.addf %11, %13 : vector<4x1xf32>
    %c0_12 = arith.constant 0 : index
    %c0_13 = arith.constant 0 : index
    %15 = vector.load %arg6[%c0_12, %c0_13] : memref<4x1xf32, #tpu.memory_space<vmem>>, vector<4x1xf32>
    tpu.vector_store %arg6[%c0_12, %c0_13], %14 {strides = array<i32>} : memref<4x1xf32, #tpu.memory_space<vmem>>, vector<4x1xf32>,
    %c0_14 = arith.constant 0 : index
    %c0_15 = arith.constant 0 : index
    %16 = vector.load %arg7[%c0_14, %c0_15] : memref<4x1xf32, #tpu.memory_space<vmem>>, vector<4x1xf32>
    %cst_16 = arith.constant dense<0.000000e+00> : vector<4xf32>
    %17 = vector.multi_reduction <add>, %10, %cst_16 [1] : vector<4x1xf32> to vector<4xf32>
    %18 = vector.shape_cast %17 : vector<4xf32> to vector<4x1xf32>
    %19 = arith.addf %16, %18 : vector<4x1xf32>
    %c0_17 = arith.constant 0 : index
    %c0_18 = arith.constant 0 : index
    %20 = vector.load %arg7[%c0_17, %c0_18] : memref<4x1xf32, #tpu.memory_space<vmem>>, vector<4x1xf32>
    tpu.vector_store %arg7[%c0_17, %c0_18], %19 {strides = array<i32>} : memref<4x1xf32, #tpu.memory_space<vmem>>, vector<4x1xf32>,
    %c0_i32_19 = arith.constant 0 : i32
    %21 = arith.cmpi eq, %arg2, %c0_i32_19 : i32
    %22 = arith.extui %21 : i1 to i32
    %c0_i32_20 = arith.constant 0 : i32
    %23 = arith.cmpi ne, %22, %c0_i32_20 : i32
    scf.if %23 {
      %c0_21 = arith.constant 0 : index
      %c0_22 = arith.constant 0 : index
      %24 = vector.load %arg6[%c0_21, %c0_22] : memref<4x1xf32, #tpu.memory_space<vmem>>, vector<4x1xf32>
      %c0_23 = arith.constant 0 : index
      %c0_24 = arith.constant 0 : index
      %c0_25 = arith.constant 0 : index
      %c0_26 = arith.constant 0 : index
      %25 = vector.load %arg5[%c0_23, %c0_24, %c0_25, %c0_26] : memref<1x1x4x2xf32, #tpu.memory_space<vmem>>, vector<1x1x4x1xf32>
      %26 = vector.shape_cast %25 : vector<1x1x4x1xf32> to vector<4x1xf32>
      %27 = vector.shape_cast %24 : vector<4x1xf32> to vector<1x1x4x1xf32>
      tpu.vector_store %arg5[%c0_23, %c0_24, %c0_25, %c0_26], %27 {strides = array<i32>} : memref<1x1x4x2xf32, #tpu.memory_space<vmem>>, vector<1x1x4x1xf32>,
      %c0_27 = arith.constant 0 : index
      %c0_28 = arith.constant 0 : index
      %28 = vector.load %arg7[%c0_27, %c0_28] : memref<4x1xf32, #tpu.memory_space<vmem>>, vector<4x1xf32>
      %c0_29 = arith.constant 0 : index
      %c0_30 = arith.constant 0 : index
      %c0_31 = arith.constant 0 : index
      %c1 = arith.constant 1 : index
      %29 = vector.load %arg5[%c0_29, %c0_30, %c0_31, %c1] : memref<1x1x4x2xf32, #tpu.memory_space<vmem>>, vector<1x1x4x1xf32>
      %30 = vector.shape_cast %29 : vector<1x1x4x1xf32> to vector<4x1xf32>
      %31 = vector.shape_cast %28 : vector<4x1xf32> to vector<1x1x4x1xf32>
      tpu.vector_store %arg5[%c0_29, %c0_30, %c0_31, %c1], %31 {strides = array<i32>} : memref<1x1x4x2xf32, #tpu.memory_space<vmem>>, vector<1x1x4x1xf32>,
    } else {
    }
    return
  }
  func.func @transform_0(%arg0: i32, %arg1: i32, %arg2: i32) -> (i32, i32, i32, i32) {
    %c1_i32 = arith.constant 1 : i32
    %0 = arith.muli %arg0, %c1_i32 : i32
    %1 = arith.addi %0, %arg2 : i32
    %c0_i32 = arith.constant 0 : i32
    %2 = arith.minsi %1, %c0_i32 : i32
    %c0_i32_0 = arith.constant 0 : i32
    %c0_i32_1 = arith.constant 0 : i32
    %c0_i32_2 = arith.constant 0 : i32
    return %arg1, %c0_i32_0, %2, %c0_i32_1 : i32, i32, i32, i32
  }
  func.func @transform_1(%arg0: i32, %arg1: i32, %arg2: i32) -> (i32, i32, i32, i32) {
    %c1_i32 = arith.constant 1 : i32
    %0 = arith.muli %arg0, %c1_i32 : i32
    %1 = arith.addi %0, %arg2 : i32
    %c0_i32 = arith.constant 0 : i32
    %2 = arith.minsi %1, %c0_i32 : i32
    %c0_i32_0 = arith.constant 0 : i32
    %c0_i32_1 = arith.constant 0 : i32
    %c0_i32_2 = arith.constant 0 : i32
    return %arg1, %c0_i32_0, %2, %c0_i32_1 : i32, i32, i32, i32
  }
  func.func @transform_2(%arg0: i32, %arg1: i32, %arg2: i32) -> (i32, i32, i32, i32) {
    %c0_i32 = arith.constant 0 : i32
    %c0_i32_0 = arith.constant 0 : i32
    %c0_i32_1 = arith.constant 0 : i32
    return %arg0, %arg1, %c0_i32, %c0_i32_0 : i32, i32, i32, i32
  }
}

</mosaic_0001>

<bundles_post_ra>
// kernel: dice_loss.1
= control target key start
LH: loop header
LB: loop body
LE: loop exit
PB: predicated region body
PF: predicated region fallthrough
CT: control target
= control target key end

     0   :  { %s592_s9 = smov 0   ;;  %s594_s10 = smov 0   ;;  %s659_s0 = inlined_call_operand.vmem [shape: f32[2,4,1,256], index: 0, kind: input, shape index: {}]   ;;  %s660_s1 = inlined_call_operand.vmem [shape: f32[2,4,1,256], index: 1, kind: input, shape index: {}]   ;;  %s661_s2 = inlined_call_operand.vmem [shape: f32[1,2,4,2], index: 2, kind: output, shape index: {}]  }
   0x1   :  { %s596_s11 = smov 0  }
   0x2 LB: > { %s27_s12 = sadd.s32 1, %s569_s10  ;;  %p519_p0 = scmp.ge.s32.totalorder %s573_s11, 1  ;;  %s573_s11 = sphi %s596_s11, %s12_s11   ;;  %s569_s10 = sphi %s594_s10, %s663_s10   ;;  %s565_s9 = sphi %s592_s9, %s662_s9  }
   0x3   : > { %p29_p1 = scmp.ge.s32.totalorder %s27_s12, 2  ;;  %p177_p2 = scmp.lt.s32.totalorder %s573_s11, 3 }
   0x5   : > { %s665_s12 = smov (%p29_p1, %s27_s12), 0  ;;  %p178_p3 = pnand %p519_p0, %p177_p2 }
   0x6   : > { %p222_p4 = scmp.lt.s32.totalorder (!%p178_p3), %s565_s9, 1  ;;  %s576_s20 = smov (!%p178_p3), 1  }
   0x7   : > { %181 = sbr.rel (%p178_p3) target bundleno = 254 (0xfe), region = 28 }
   0xc   : > { %s667_s9 = smov (!%p222_p4, %s565_s9), 1  ;;  %vm298_vm0 = vcmask 1040384   ;;  %vm259_vm1 = vcmask 3072   ;;  %v575_v56 = vmov 0.0   ;;  %vm369_vm2 = vcmask 1041409  }
   0xd   : > { %s520_s13 = sshll.u32 %s667_s9, 3  ;;  %261 = vst.msk [vmem:[#allocation3] sm:$0xf] %vm259_vm1, %v575_v56  ;;  %vm372_vm3 = vcmask 1042434   ;;  %vm375_vm4 = vcmask 1043459   ;;  %s522_s21 = sshll.u32 %s667_s9, 2 }
   0xe   : > { %s229_s16 = scalar_lea.vmem %s659_s0, %s520_s13  ;;  %s243_s19 = scalar_lea.vmem %s660_s1, %s520_s13  ;;  %260 = vst.msk [vmem:[#allocation2] sm:$0xf] %vm259_vm1, %v575_v56  ;;  %vm409_vm5 = vcmask 11272  }
   0xf   : > { %v263_v0 = vld [vmem:[%s229_s16 + $0x2] sm:$0x3]  ;;  %v262_v2 = vld [vmem:[%s229_s16] sm:$0x3]  ;;  %v264_v5 = vld [vmem:[%s229_s16 + $0x4] sm:$0x3]  ;;  %s254_s24 = scalar_lea.vmem %s661_s2, %s522_s21 }
  0x10   : > { %v267_v1 = vld [vmem:[%s243_s19 + $0x2] sm:$0x3]  ;;  %v266_v4 = vld [vmem:[%s243_s19] sm:$0x3]  ;;  %v268_v6 = vld [vmem:[%s243_s19 + $0x4] sm:$0x3] }
  0x11   : > { %v275_v3 = vadd.f32 %v267_v1, %v263_v0  ;;  %v271_v7 = vmul.f32 %v267_v1, %v263_v0  ;;  %v274_v8 = vadd.f32 %v266_v4, %v262_v2  ;;  %v276_v9 = vadd.f32 %v268_v6, %v264_v5  ;;  %v265_v10 = vld [vmem:[%s229_s16 + $0x6] sm:$0x3] }
  0x12   : > { %v269_v11 = vld [vmem:[%s243_s19 + $0x6] sm:$0x3]  ;;  %v272_v27 = vmul.f32 %v268_v6, %v264_v5  ;;  %v270_v31 = vmul.f32 %v266_v4, %v262_v2 }
  0x13   : > { %v325_v12 = vperm.slane %v275_v3, 0  ;;  %v326_v13 = vperm.slane %v275_v3, 1  ;;  %v277_v14 = vadd.f32 %v269_v11, %v265_v10  ;;  %v284_v15 = vperm.slane %v271_v7, 0 }
  0x14   : > { %v323_v16 = vperm.slane %v274_v8, 0  ;;  %v324_v17 = vperm.slane %v274_v8, 1  ;;  %v327_v18 = vperm.slane %v276_v9, 0  ;;  %v328_v19 = vperm.slane %v276_v9, 1  ;;  %v381_v1 = vld [vmem:[#allocation3] sm:$0xf] }
  0x15   : > { %v344_v20 = vsel %vm298_vm0, %v325_v12, 0.0  ;;  %v345_v21 = vsel %vm298_vm0, %v326_v13, 0.0  ;;  %v329_v22 = vperm.slane %v277_v14, 0  ;;  %v330_v23 = vperm.slane %v277_v14, 1  ;;  %v359_v13 = vld [vmem:[#allocation2] sm:$0xf] }
  0x16   : > { %v346_v24 = vadd.f32 %v345_v21, %v344_v20  ;;  %v339_v25 = vsel %vm298_vm0, %v323_v16, 0.0  ;;  %v340_v26 = vsel %vm298_vm0, %v324_v17, 0.0  ;;  %v285_v29 = vperm.slane %v271_v7, 1 }
  0x17   : > { %v341_v28 = vadd.f32 %v340_v26, %v339_v25  ;;  %v304_v30 = vsel %vm298_vm0, %v284_v15, 0.0  ;;  %v349_v32 = vsel %vm298_vm0, %v327_v18, 0.0  ;;  %v350_v33 = vsel %vm298_vm0, %v328_v19, 0.0 }
  0x18   : > { %347 = vadd.xlane.f32.xlu0 %v346_v24  ;;  %v354_v34 = vsel %vm298_vm0, %v329_v22, 0.0  ;;  %v355_v35 = vsel %vm298_vm0, %v330_v23, 0.0  ;;  %v305_v36 = vsel %vm298_vm0, %v285_v29, 0.0  ;;  %v286_v37 = vperm.slane %v272_v27, 0 }
  0x19   : > { %342 = vadd.xlane.f32.xlu1 %v341_v28  ;;  %v287_v38 = vperm.slane %v272_v27, 1  ;;  %v273_v39 = vmul.f32 %v269_v11, %v265_v10  ;;  %v306_v40 = vadd.f32 %v305_v36, %v304_v30  ;;  %v351_v41 = vadd.f32 %v350_v33, %v349_v32 }
  0x1a   : > { %v356_v42 = vadd.f32 %v355_v35, %v354_v34  ;;  %v282_v43 = vperm.slane %v270_v31, 0  ;;  %v283_v44 = vperm.slane %v270_v31, 1  ;;  %v309_v45 = vsel %vm298_vm0, %v286_v37, 0.0 }
  0x1b   : > { %307 = vadd.xlane.f32.xlu2 %v306_v40  ;;  %v310_v46 = vsel %vm298_vm0, %v287_v38, 0.0  ;;  %v288_v47 = vperm.slane %v273_v39, 0  ;;  %v289_v48 = vperm.slane %v273_v39, 1 }
  0x1c   : > { %v311_v49 = vadd.f32 %v310_v46, %v309_v45  ;;  %v299_v50 = vsel %vm298_vm0, %v282_v43, 0.0  ;;  %v300_v51 = vsel %vm298_vm0, %v283_v44, 0.0 }
  0x1d   : > { %v314_v52 = vsel %vm298_vm0, %v288_v47, 0.0  ;;  %v315_v53 = vsel %vm298_vm0, %v289_v48, 0.0  ;;  %v301_v54 = vadd.f32 %v300_v51, %v299_v50 }
  0x1e   : > { %v316_v55 = vadd.f32 %v315_v53, %v314_v52 }
  0x20   : > { %352 = vadd.xlane.f32.xlu0 %v351_v41 }
  0x21   : > { %357 = vadd.xlane.f32.xlu1 %v356_v42 }
  0x23   : > { %312 = vadd.xlane.f32.xlu2 %v311_v49 }
  0x28   : > { %302 = vadd.xlane.f32.xlu0 %v301_v54 }
  0x29   : > { %317 = vadd.xlane.f32.xlu1 %v316_v55 }
  0x8b   : > { %v348_v57 = vpop.xlane.xlu0 %347 }
  0x8c   : > { %v343_v58 = vpop.xlane.xlu1 %342  ;;  %v390_v60 = vrot.slane %v348_v57, 7 }
  0x8e   : > { %v308_v59 = vpop.xlane.xlu2 %307  ;;  %v391_v0 = vsel %vm369_vm2, %v390_v60, %v343_v58 }
  0x8f   : > { %v368_v6 = vrot.slane %v308_v59, 7 }
  0x93   : > { %v353_v61 = vpop.xlane.xlu0 %352 }
  0x94   : > { %v392_v62 = vrot.slane %v353_v61, 6  ;;  %v358_v63 = vpop.xlane.xlu1 %357 }
  0x95   : > { %v394_v2 = vrot.slane %v358_v63, 5 }
  0x96   : > { %v393_v3 = vsel %vm372_vm3, %v392_v62, %v391_v0  ;;  %v313_v7 = vpop.xlane.xlu2 %312 }
  0x97   : > { %v395_v4 = vsel %vm375_vm4, %v394_v2, %v393_v3  ;;  %v371_v8 = vrot.slane %v313_v7, 6 }
  0x98   : > { %v397_v5 = vadd.f32 %v395_v4, %v381_v1 }
  0x9a   : > { %398 = vst.msk [vmem:[#allocation3] sm:$0xf] %vm259_vm1, %v397_v5 }
  0x9b   : > { %v303_v9 = vpop.xlane.xlu0 %302 }
  0x9c   : > { %v318_v10 = vpop.xlane.xlu1 %317  ;;  %v370_v11 = vsel %vm369_vm2, %v368_v6, %v303_v9 }
  0x9d   : > { %v374_v12 = vrot.slane %v318_v10, 5  ;;  %v373_v14 = vsel %vm372_vm3, %v371_v8, %v370_v11 }
  0x9f   : > { %v376_v15 = vsel %vm375_vm4, %v374_v12, %v373_v14 }
  0xa0   : > { %v378_v16 = vadd.f32 %v376_v15, %v359_v13 }
  0xa1   : > { %v404_v17 = vld [vmem:[#allocation3] sm:$0xf] }
  0xa2   : > { %406 = vrot.lane.b32.xlu2 %v404_v17, %s576_s20  ;;  %380 = vst.msk [vmem:[#allocation2] sm:$0xf] %vm259_vm1, %v378_v16 }
  0xa9   : > { %v402_v18 = vld [vmem:[#allocation2] sm:$0xf] }
  0xaa   : > { %403 = vst.msk [vmem:[%s254_s24] sm:$0xf] %vm259_vm1, %v402_v18 }
  0xfc   : > { %v407_v19 = vpop.permute.xlu2 %406 }
  0xfd   : > { %410 = vst.msk [vmem:[%s254_s24] sm:$0xf] %vm409_vm5, %v407_v19 }
  0xfe PF: > { %s12_s11 = sadd.s32 1, %s573_s11   ;;  %s662_s9 = smov %s569_s10 }
  0xff   : > { %p9_p5 = scmp.ge.s32.totalorder %s12_s11, 4   ;;  %s663_s10 = smov %s665_s12 }
 0x101   :  { %11 = sbr.rel (!%p9_p5) target bundleno = 2 (0x2), region = 69 }

</bundles_post_ra>
